<compile_context>
chip_gen: v7x
topology: tpu7x:2x2x1
jax: 0.10.0
libtpu: 0.0.40
codegen_flags: <defaults>
</compile_context>

<pallas_src>
import jax
import jax.numpy as jnp
from jax import lax
from jax.experimental import pallas as pl
from jax.experimental.pallas import tpu as pltpu


_SMALL_M = 64  # scalar-SMEM path threshold (unrolled loop; keep compile time sane)


# --------------------------------------------------------------------------
# Small-M path: gridless, all-SMEM, unrolled scalar gather.
# --------------------------------------------------------------------------
def _index_select_smem_kernel(x_ref, idx_ref, out_ref):
    # x_ref:   (N,) float32  SMEM
    # idx_ref: (M,) int32    SMEM
    # out_ref: (M,) float32  SMEM
    N = x_ref.shape[0]
    M = out_ref.shape[0]
    for j in range(M):  # tiny static extent -> fully unrolled on the scalar core
        i = jnp.clip(idx_ref[j], 0, N - 1)
        out_ref[j] = x_ref[i]


def _index_select_small(x, idx32):
    N = x.shape[0]
    M = idx32.shape[0]
    return pl.pallas_call(
        _index_select_smem_kernel,
        out_shape=jax.ShapeDtypeStruct((M,), x.dtype),
        in_specs=[
            pl.BlockSpec(memory_space=pltpu.MemorySpace.SMEM),  # x
            pl.BlockSpec(memory_space=pltpu.MemorySpace.SMEM),  # indices
        ],
        out_specs=pl.BlockSpec(memory_space=pltpu.MemorySpace.SMEM),
        cost_estimate=pl.CostEstimate(
            flops=0, transcendentals=0, bytes_accessed=4 * (N + 2 * M)
        ),
    )(x, idx32)


# --------------------------------------------------------------------------
# Large-M path: lane-dense VMEM output, VPU compare+select gather.
# --------------------------------------------------------------------------
def _index_select_vec_kernel(x_ref, idx_ref, out_ref):
    # x_ref:   (N,)        float32 SMEM  (scalar broadcast source)
    # idx_ref: (R_pad,128) int32   VMEM  (already clamped to [0, N-1])
    # out_ref: (R_pad,128) float32 VMEM  (lane-dense -> unmasked stores)
    N = x_ref.shape[0]
    idx = idx_ref[...]

    def body(n, acc):
        # VPU compare + select; x_ref[n] is a scalar SMEM load broadcast to the tile.
        return jnp.where(idx == n, x_ref[n], acc)

    out_ref[...] = lax.fori_loop(0, N, body, jnp.zeros_like(out_ref))


def _index_select_vec(x, idx32):
    N = x.shape[0]
    M = idx32.shape[0]
    idx32 = jnp.clip(idx32, 0, N - 1)

    rows = pl.cdiv(M, 128)
    rows_pad = pl.cdiv(rows, 8) * 8          # sublane-aligned
    m_pad = rows_pad * 128                   # lane-dense slab
    idx_2d = jnp.pad(idx32, (0, m_pad - M)).reshape(rows_pad, 128)

    out_2d = pl.pallas_call(
        _index_select_vec_kernel,
        out_shape=jax.ShapeDtypeStruct((rows_pad, 128), x.dtype),
        in_specs=[
            pl.BlockSpec(memory_space=pltpu.MemorySpace.SMEM),  # x
            pl.BlockSpec(memory_space=pltpu.MemorySpace.VMEM),  # indices slab
        ],
        out_specs=pl.BlockSpec(memory_space=pltpu.MemorySpace.VMEM),
        cost_estimate=pl.CostEstimate(
            flops=0, transcendentals=0, bytes_accessed=4 * (N + 2 * m_pad)
        ),
    )(x, idx_2d)
    return out_2d.reshape(m_pad)[:M]


# --------------------------------------------------------------------------
# Public wrapper
# --------------------------------------------------------------------------
def index_select_whole_tensor(x, indices):
    """x: float32[N], indices: int[M]  ->  float32[M] (= x[indices])."""
    # Keep int32 indices as-is; only narrow when the caller hands us wider ints.
    idx32 = indices if indices.dtype == jnp.int32 else indices.astype(jnp.int32)
    if indices.shape[0] <= _SMALL_M:
        return _index_select_small(x, idx32)
    return _index_select_vec(x, idx32)


if __name__ == "__main__":
    key = jax.random.PRNGKey(0)
    k_x, k_i, k_x2, k_i2 = jax.random.split(key, 4)

    # 1) Shapes from the module annotation: input [3] f32, indices [3] int.
    x = jax.random.normal(k_x, (3,), dtype=jnp.float32)
    indices = jax.random.randint(k_i, (3,), 0, 3, dtype=jnp.int32)

    out = index_select_whole_tensor(x, indices)
    out = jax.block_until_ready(out)
    ref = x[indices]
    assert out.shape == ref.shape and out.dtype == ref.dtype, (out.shape, ref.shape)
    assert bool(jnp.allclose(out, ref)), (out, ref)

    # 2) Exercise the vectorized lane-dense fallback (M > threshold).
    x_big = jax.random.normal(k_x2, (200,), dtype=jnp.float32)
    idx_big = jax.random.randint(k_i2, (300,), 0, 200, dtype=jnp.int32)

    out_big = index_select_whole_tensor(x_big, idx_big)
    out_big = jax.block_until_ready(out_big)
    ref_big = x_big[idx_big]
    assert out_big.shape == ref_big.shape and out_big.dtype == ref_big.dtype
    assert bool(jnp.allclose(out_big, ref_big)), (out_big, ref_big)

    print("KERNEL_OK")
</pallas_src>

<mosaic_0001>
module attributes {stable_mosaic.version = 11 : i64} {
  func.func @_index_select_smem_kernel(%arg0: memref<3xf32, #tpu.memory_space<smem>>, %arg1: memref<3xi32, #tpu.memory_space<smem>>, %arg2: memref<3xf32, #tpu.memory_space<smem>>) attributes {dimension_semantics = [], scalar_prefetch = 0 : i64, scratch_operands = 0 : i64, tpu.core_type = #tpu.core_type<tc>} {
    %c0 = arith.constant 0 : index
    %0 = memref.load %arg1[%c0] : memref<3xi32, #tpu.memory_space<smem>>
    %c0_i32 = arith.constant 0 : i32
    %c2_i32 = arith.constant 2 : i32
    %1 = arith.maxsi %c0_i32, %0 : i32
    %2 = arith.minsi %c2_i32, %1 : i32
    %3 = arith.index_cast %2 : i32 to index
    %4 = memref.load %arg0[%3] : memref<3xf32, #tpu.memory_space<smem>>
    %c0_0 = arith.constant 0 : index
    %5 = memref.load %arg2[%c0_0] : memref<3xf32, #tpu.memory_space<smem>>
    memref.store %4, %arg2[%c0_0] : memref<3xf32, #tpu.memory_space<smem>>
    %c1 = arith.constant 1 : index
    %6 = memref.load %arg1[%c1] : memref<3xi32, #tpu.memory_space<smem>>
    %c0_i32_1 = arith.constant 0 : i32
    %c2_i32_2 = arith.constant 2 : i32
    %7 = arith.maxsi %c0_i32_1, %6 : i32
    %8 = arith.minsi %c2_i32_2, %7 : i32
    %9 = arith.index_cast %8 : i32 to index
    %10 = memref.load %arg0[%9] : memref<3xf32, #tpu.memory_space<smem>>
    %c1_3 = arith.constant 1 : index
    %11 = memref.load %arg2[%c1_3] : memref<3xf32, #tpu.memory_space<smem>>
    memref.store %10, %arg2[%c1_3] : memref<3xf32, #tpu.memory_space<smem>>
    %c2 = arith.constant 2 : index
    %12 = memref.load %arg1[%c2] : memref<3xi32, #tpu.memory_space<smem>>
    %c0_i32_4 = arith.constant 0 : i32
    %c2_i32_5 = arith.constant 2 : i32
    %13 = arith.maxsi %c0_i32_4, %12 : i32
    %14 = arith.minsi %c2_i32_5, %13 : i32
    %15 = arith.index_cast %14 : i32 to index
    %16 = memref.load %arg0[%15] : memref<3xf32, #tpu.memory_space<smem>>
    %c2_6 = arith.constant 2 : index
    %17 = memref.load %arg2[%c2_6] : memref<3xf32, #tpu.memory_space<smem>>
    memref.store %16, %arg2[%c2_6] : memref<3xf32, #tpu.memory_space<smem>>
    return
  }
}

</mosaic_0001>

<bundles_post_ra>
// kernel: tpu_custom_call.1
= control target key start
LH: loop header
LB: loop body
LE: loop exit
PB: predicated region body
PF: predicated region fallthrough
CT: control target
= control target key end

     0   :  { %7 = vsyncpa [#allocation3], 0  ;;  %s183_s0 = inlined_call_operand.hbm [shape: f32[3], index: 0, kind: input, shape index: {}]   ;;  %s184_s1 = inlined_call_operand.vmem [shape: s32[3], index: 1, kind: input, shape index: {}]   ;;  %s185_s2 = inlined_call_operand.hbm [shape: f32[3], index: 2, kind: output, shape index: {}]  }
   0x1   :  { %8 = vsyncpa [#allocation5], 0 }
   0x2   :  { %9 = vsyncpa [#allocation4], 0  ;;  %s24_s11 = sshll.u32 %s184_s1, 4  ;;  %s100_s14 = scalar_lea.hbm %s183_s0, 16  ;;  %s25_s11 = int_to_ptr.vmem [resolvable:$true] %s24_s11 }
   0x3   :  { %p101_p0 = scmp.ne.s32.totalorder %s183_s0, %s100_s14  ;;  %p104_p1 = scmp.lt.u32.totalorder %s100_s14, %s183_s0 }
   0x5   :  { %p106_p2 = pnand %p104_p1, %p101_p0 }
   0x7   :  { %109 = shalt.err (!%p106_p2)
}
   0x8   :  { %s138_s19 = smov [#allocation2]   ;;  %s110_s1 = scalar_lea.vmem %s25_s11, 16 }
   0x9   :  { %17 = dma.hbm_to_smem %s183_s0, 16, %s138_s19, [#allocation3]  }
   0xa   :  { %p111_p3 = scmp.ne.s32.totalorder %s25_s11, %s110_s1  ;;  %p115_p4 = scmp.lt.s32.totalorder %s25_s11, %s25_s11 }
   0xb   :  { %p116_p5 = scmp.lt.s32.totalorder %s110_s1, %s110_s1 }
   0xd   :  { %p117_p6 = por %p116_p5, %p115_p4 }
   0xf   :  { %p118_p7 = pnand %p117_p6, %p111_p3 }
  0x11   :  { %121 = shalt.err (!%p118_p7)
}
  0x12   :  { %s139_s22 = smov [#allocation6]  }
  0x13   :  { %27 = dma.vmem_to_smem %s25_s11, 16, %s139_s22, [#allocation5]  }
  0x14   :  { %132 = dma.done.wait [#allocation3], 16  }
  0x15   :  { %133 = vsyncadd [#allocation3], 4294967280 }
  0x16   :  { %134 = dma.done.wait [#allocation5], 16  }
  0x17   :  { %135 = vsyncadd [#allocation5], 4294967280 }
  0x18   :  { %34 = sfence }
  0x19   :  { %s35_s23 = sld [smem:[#allocation6]]  ;;  %s79_s24 = sld [smem:[#allocation6 + $0x1]] }
  0x1a   :  { %s85_s25 = sld [smem:[#allocation6 + $0x2]]  ;;  %s122_s30 = scalar_lea.hbm %s185_s2, 16 }
  0x1b   :  { %p123_p0 = scmp.ne.s32.totalorder %s185_s2, %s122_s30  ;;  %p126_p1 = scmp.lt.u32.totalorder %s122_s30, %s185_s2 }
  0x1d   :  { %p128_p2 = pnand %p126_p1, %p123_p0 }
  0x1f   :  { %p36_p8 = scmp.gt.s32.totalorder %s35_s23, 0  ;;  %p74_p9 = scmp.lt.s32.totalorder %s35_s23, 2 }
  0x20   :  { %p44_p10 = scmp.gt.s32.totalorder %s79_s24, 0  ;;  %p80_p11 = scmp.lt.s32.totalorder %s79_s24, 2 }
  0x21   :  { %s187_s23 = smov (!%p36_p8, %s35_s23), 0  ;;  %p52_p12 = scmp.gt.s32.totalorder %s85_s25, 0 }
  0x22   :  { %s189_s24 = smov (!%p44_p10, %s79_s24), 0  ;;  %s191_s23 = smov (!%p74_p9, %s187_s23), 2 }
  0x23   :  { %s193_s24 = smov (!%p80_p11, %s189_s24), 2  ;;  %s40_s0 = sld [smem:[#allocation2 + %s191_s23]] }
  0x24   :  { %s48_s26 = sld [smem:[#allocation2 + %s193_s24]]  ;;  %p86_p13 = scmp.lt.s32.totalorder %s85_s25, 2 }
  0x25   :  { %s195_s25 = smov (!%p52_p12, %s85_s25), 0 }
  0x26   :  { %s197_s25 = smov (!%p86_p13, %s195_s25), 2 }
  0x27   :  { %s56_s27 = sld [smem:[#allocation2 + %s197_s25]] }
  0x29   :  { %42 = sst [smem:[#allocation7]] %s40_s0 }
  0x2a   :  { %50 = sst [smem:[#allocation7 + $0x1]] %s48_s26 }
  0x2d   :  { %58 = sst [smem:[#allocation7 + $0x2]] %s56_s27 }
  0x2e   :  { %131 = shalt.err (!%p128_p2)
}
  0x2f   :  { %s140_s7 = smov [#allocation7]  }
  0x30   :  { %66 = dma.smem_to_hbm %s140_s7, 16, %s185_s2, [#allocation4]  }
  0x31   :  { %136 = dma.done.wait [#allocation4], 16  }
  0x32   :  { %137 = vsyncadd [#allocation4], 4294967280 }
  0x33   :  { %70 = sfence }
  0x34   :  { %71 = vsyncpa [#allocation3], 1 }
  0x35   :  { %72 = vsyncpa [#allocation4], 1 }
  0x36   :  { %73 = vsyncpa [#allocation5], 1 }

</bundles_post_ra>
